<compile_context>
chip_gen: v7x
topology: tpu7x:2x2x1
jax: 0.10.0
libtpu: 0.0.40
codegen_flags: <defaults>
</compile_context>

<pallas_src>
import functools

import jax
import jax.numpy as jnp
from jax.experimental import pallas as pl
from jax.experimental.pallas import tpu as pltpu


# ---------------------------------------------------------------------------
# Helpers
# ---------------------------------------------------------------------------
def _vmem_capacity_bytes():
    """Physical VMEM of the current chip; conservative fallback if unknown."""
    try:
        return int(pltpu.get_tpu_info().vmem_capacity_bytes)
    except Exception:
        return 64 * 1024 * 1024  # v7x per-TensorCore VMEM (smallest of the three)


def _largest_divisor_leq(n, cap):
    cap = max(1, min(int(cap), int(n)))
    for d in range(cap, 0, -1):
        if n % d == 0:
            return d
    return 1


def _fc_sigmoid(pooled_c2, w1, w2):
    """Shared MLP on a stacked (C, 2) = [avg | max] matrix -> (C, 1) attention."""
    h = jnp.dot(w1, pooled_c2, preferred_element_type=jnp.float32)      # (hid, 2)
    h = jnp.maximum(h, 0.0)                                             # ReLU
    logits2 = jnp.dot(w2, h, preferred_element_type=jnp.float32)        # (C, 2)
    logits = logits2[:, 0:1] + logits2[:, 1:2]                          # (C, 1)
    return 1.0 / (1.0 + jnp.exp(-logits))                               # sigmoid


# ---------------------------------------------------------------------------
# Path A: fused kernel — (Bt, C, HW) slab per grid step resident in VMEM.
# 2 HBM passes over x (read + write): the bandwidth optimum for this op.
# ---------------------------------------------------------------------------
def _fused_kernel(x_ref, w1_ref, w2_ref, o_ref):
    # x_ref/o_ref: (Bt, C, HW); w1: (hid, C); w2: (C, hid)
    w1 = w1_ref[...]
    w2 = w2_ref[...]

    @pl.loop(0, x_ref.shape[0])
    def _(i):
        x = x_ref[i].astype(jnp.float32)                                # (C, HW)
        hw = x.shape[-1]
        avg = jnp.sum(x, axis=-1, keepdims=True) * (1.0 / hw)           # (C, 1)
        mx = jnp.max(x, axis=-1, keepdims=True)                         # (C, 1)
        pooled = jnp.concatenate([avg, mx], axis=1)                     # (C, 2)
        att = _fc_sigmoid(pooled, w1, w2)                               # (C, 1)
        o_ref[i] = (x * att).astype(o_ref.dtype)                        # bcast over HW


def _fused_call(x, w1, w2, slab_budget_bytes, vmem_limit_bytes):
    B, C, HW = x.shape
    hidden = w1.shape[0]
    itemsize = x.dtype.itemsize
    slab_bytes = C * HW * itemsize

    # Pack Bt batches per grid step so each step moves at least a few MB
    # (amortizes the ~0.35 us per-step overhead), bounded by the VMEM budget.
    # Cap at B//2 so a 2-TensorCore chip (v7x) still has >=2 parallel steps.
    bt_vmem = max(1, slab_budget_bytes // max(1, slab_bytes))
    bt_cores = max(1, B // 2)
    bt = _largest_divisor_leq(B, min(bt_vmem, bt_cores))

    return pl.pallas_call(
        _fused_kernel,
        out_shape=jax.ShapeDtypeStruct((B, C, HW), x.dtype),
        grid_spec=pltpu.PrefetchScalarGridSpec(
            num_scalar_prefetch=0,
            grid=(B // bt,),
            in_specs=[
                pl.BlockSpec((bt, C, HW), lambda b: (b, 0, 0)),
                pl.BlockSpec((hidden, C), lambda b: (0, 0)),
                pl.BlockSpec((C, hidden), lambda b: (0, 0)),
            ],
            out_specs=pl.BlockSpec((bt, C, HW), lambda b: (b, 0, 0)),
        ),
        compiler_params=pltpu.CompilerParams(
            dimension_semantics=("parallel",),
            vmem_limit_bytes=int(vmem_limit_bytes)),
        cost_estimate=pl.CostEstimate(
            flops=int(3 * B * C * HW + 8 * B * C * hidden),
            transcendentals=int(B * C),
            bytes_accessed=int(2 * B * C * HW * itemsize)),
    )(x, w1, w2)


# ---------------------------------------------------------------------------
# Path B: single-call "reduce-then-apply" — HW tiled, phase axis in the grid.
# grid = (B, 2, num_t):
#   phase 0: pool tiles into a (C,2) VMEM scratch; on the last tile run the FC
#            and store the (C,1) attention into a VMEM scratch.
#   phase 1: out_tile = x_tile * att.
# Output index_map is (b, 0, p*t): during phase 0 the output block index never
# changes, so no garbage is written back; each output block is written to HBM
# exactly once (after phase 1 fills it).  Total traffic: 2 reads + 1 write of x.
# ---------------------------------------------------------------------------
def _split_kernel(x_ref, w1_ref, w2_ref, o_ref, acc_ref, att_ref, *, hw_total, masked):
    p = pl.program_id(1)
    t = pl.program_id(2)
    num_t = pl.num_programs(2)
    x = x_ref[...].astype(jnp.float32)                                  # (C, thw)
    c = x.shape[0]

    @pl.when(p == 0)
    def _reduce_phase():
        @pl.when(t == 0)
        def _():
            acc_ref[:, 0:1] = jnp.zeros((c, 1), jnp.float32)
            acc_ref[:, 1:2] = jnp.full((c, 1), -jnp.inf, jnp.float32)

        def accum(xs, xm):
            acc_ref[:, 0:1] = acc_ref[:, 0:1] + jnp.sum(xs, axis=1, keepdims=True)
            acc_ref[:, 1:2] = jnp.maximum(acc_ref[:, 1:2],
                                          jnp.max(xm, axis=1, keepdims=True))

        if masked:
            # Only the tail tile pays for the iota/compare/select filler.
            @pl.when(t == num_t - 1)
            def _():
                col = t * x.shape[1] + jax.lax.broadcasted_iota(jnp.int32, x.shape, 1)
                valid = col < hw_total
                accum(jnp.where(valid, x, 0.0), jnp.where(valid, x, -jnp.inf))

            @pl.when(t < num_t - 1)
            def _():
                accum(x, x)
        else:
            accum(x, x)

        @pl.when(t == num_t - 1)
        def _():
            avg = acc_ref[:, 0:1] * (1.0 / hw_total)
            pooled = jnp.concatenate([avg, acc_ref[:, 1:2]], axis=1)     # (C, 2)
            att_ref[...] = _fc_sigmoid(pooled, w1_ref[...], w2_ref[...]) # (C, 1)

    @pl.when(p == 1)
    def _apply_phase():
        o_ref[...] = (x * att_ref[...]).astype(o_ref.dtype)


def _split_call(x, w1, w2, vmem_limit_bytes, weights_bytes, thw_override=None):
    B, C, HW = x.shape
    hidden = w1.shape[0]
    itemsize = x.dtype.itemsize

    if thw_override is not None:
        thw = int(thw_override)
    else:
        # Real per-step VMEM ~= 2x input block + 2x output block (double-buffered).
        budget = vmem_limit_bytes - 4 * weights_bytes - (4 << 20)
        cap_lanes = max(128, budget // (4 * C * itemsize))
        # Keep tiles multi-MiB (>=512 lanes; cap at 8192 to leave VMEM headroom).
        thw = max(128, min(8192, (cap_lanes // 128) * 128))
    if thw >= HW:
        thw = HW                       # full extent (need not be a multiple of 128)
    num_t = pl.cdiv(HW, thw)
    masked = (HW % thw) != 0

    kernel = functools.partial(_split_kernel, hw_total=HW, masked=masked)
    return pl.pallas_call(
        kernel,
        out_shape=jax.ShapeDtypeStruct((B, C, HW), x.dtype),
        grid_spec=pltpu.PrefetchScalarGridSpec(
            num_scalar_prefetch=0,
            grid=(B, 2, num_t),
            in_specs=[
                pl.BlockSpec((pl.Squeezed(), C, thw), lambda b, p, t: (b, 0, t)),
                pl.BlockSpec((hidden, C), lambda b, p, t: (0, 0)),
                pl.BlockSpec((C, hidden), lambda b, p, t: (0, 0)),
            ],
            # p*t keeps the output block resident (no writeback) during phase 0;
            # phase 1 then visits 0..num_t-1 and each block is written back once.
            out_specs=pl.BlockSpec((pl.Squeezed(), C, thw),
                                   lambda b, p, t: (b, 0, p * t)),
            scratch_shapes=[pltpu.VMEM((C, 2), jnp.float32),
                            pltpu.VMEM((C, 1), jnp.float32)],
        ),
        compiler_params=pltpu.CompilerParams(
            dimension_semantics=("parallel", "arbitrary", "arbitrary"),
            vmem_limit_bytes=int(vmem_limit_bytes)),
        cost_estimate=pl.CostEstimate(
            flops=int(3 * B * C * HW + 8 * B * C * hidden),
            transcendentals=int(B * C),
            bytes_accessed=int(3 * B * C * HW * itemsize)),
    )(x, w1, w2)


# ---------------------------------------------------------------------------
# Public wrapper.
# ---------------------------------------------------------------------------
def channel_attention(x_nchw, w1_conv, w2_conv, *, vmem_limit_bytes=None,
                      force_split=False, split_thw=None):
    """x_nchw: (B, C, H, W) float32.
    w1_conv: (C//16, C, 1, 1)  (PyTorch Conv2d weight layout)
    w2_conv: (C, C//16, 1, 1)
    Returns (B, C, H, W) float32."""
    B, C, H, W = x_nchw.shape
    hidden = w1_conv.shape[0]
    HW = H * W
    itemsize = x_nchw.dtype.itemsize

    # Free reshapes only — no HBM transpose passes: C on sublanes, HW on lanes.
    x = x_nchw.reshape(B, C, HW)
    w1 = w1_conv.reshape(hidden, C)
    w2 = w2_conv.reshape(C, hidden)

    # Generation-aware VMEM sizing: v5e/v6e 128 MiB -> ~112 MiB limit,
    # v7x 64 MiB -> ~56 MiB limit.
    vmem_cap = _vmem_capacity_bytes()
    if vmem_limit_bytes is None:
        vmem_limit_bytes = max(16 << 20, min(vmem_cap - (8 << 20), (vmem_cap * 7) // 8))
    weights_bytes = (w1.size + w2.size) * itemsize

    # Fused path holds double-buffered input + output blocks (~4x the slab)
    # plus (possibly double-buffered) weights and pipeline slack.
    slab_budget = max(0, (vmem_limit_bytes - 4 * weights_bytes - (4 << 20)) // 4)
    slab_bytes = C * HW * itemsize

    if (not force_split) and slab_bytes <= slab_budget:
        out = _fused_call(x, w1, w2, slab_budget, vmem_limit_bytes)      # 2 HBM passes
    else:
        out = _split_call(x, w1, w2, vmem_limit_bytes, weights_bytes,
                          thw_override=split_thw)                        # 3 HBM passes

    return out.reshape(B, C, H, W)


def _reference(x_nchw, w1_conv, w2_conv):
    # Pure-JAX reference mirroring the PyTorch forward.
    B, C, H, W = x_nchw.shape
    hidden = w1_conv.shape[0]
    avg = jnp.mean(x_nchw, axis=(2, 3))                     # (B, C)
    mx = jnp.max(x_nchw, axis=(2, 3))                       # (B, C)
    w1 = w1_conv.reshape(hidden, C)
    w2 = w2_conv.reshape(C, hidden)

    def fc(p):
        h = jnp.maximum(p @ w1.T, 0.0)
        return h @ w2.T

    att = jax.nn.sigmoid(fc(avg) + fc(mx))                  # (B, C)
    return x_nchw * att[:, :, None, None]


if __name__ == "__main__":
    key = jax.random.PRNGKey(0)
    k_x, k_w1, k_w2 = jax.random.split(key, 3)

    # in_planes must be >= 16 (the module hardcodes // 16 in the fc).
    B, C, H, W = 2, 32, 16, 16
    hidden = C // 16

    x = jax.random.normal(k_x, (B, C, H, W), dtype=jnp.float32)
    # Deterministic synthetic conv weights (PyTorch layout: (out, in, 1, 1)).
    w1_conv = jax.random.normal(k_w1, (hidden, C, 1, 1), dtype=jnp.float32) * 0.1
    w2_conv = jax.random.normal(k_w2, (C, hidden, 1, 1), dtype=jnp.float32) * 0.1

    ref = _reference(x, w1_conv, w2_conv)

    # Path A: fused whole-slab path (2 HBM passes).
    out_fused = jax.block_until_ready(channel_attention(x, w1_conv, w2_conv))
    assert out_fused.shape == (B, C, H, W)
    assert jnp.allclose(out_fused, ref, atol=1e-5, rtol=1e-5), "fused path mismatch"

    # Path A with batch tiling exercised (Bt > 1 per grid step).
    xb = jax.random.normal(k_x, (8, C, H, W), dtype=jnp.float32)
    refb = _reference(xb, w1_conv, w2_conv)
    out_bt = jax.block_until_ready(channel_attention(xb, w1_conv, w2_conv))
    assert jnp.allclose(out_bt, refb, atol=1e-5, rtol=1e-5), "batch-tiled fused mismatch"

    # Path B: force the single-call HW-tiled reduce-then-apply path.
    out_split = jax.block_until_ready(
        channel_attention(x, w1_conv, w2_conv, force_split=True, split_thw=128))
    assert jnp.allclose(out_split, ref, atol=1e-5, rtol=1e-5), "split path mismatch"

    # Path B with a ragged spatial extent (exercises the masked tail tile only).
    x2 = jax.random.normal(k_x, (1, C, 9, 17), dtype=jnp.float32)   # HW = 153
    ref2 = _reference(x2, w1_conv, w2_conv)
    out_ragged = jax.block_until_ready(
        channel_attention(x2, w1_conv, w2_conv, force_split=True, split_thw=128))
    assert jnp.allclose(out_ragged, ref2, atol=1e-5, rtol=1e-5), "ragged split mismatch"

    print("KERNEL_OK")
</pallas_src>

<mosaic_0001>
module attributes {stable_mosaic.version = 11 : i64} {
  func.func @_fused_kernel(%arg0: i32, %arg1: memref<1x32x256xf32, #tpu.memory_space<vmem>>, %arg2: memref<2x32xf32, #tpu.memory_space<vmem>>, %arg3: memref<32x2xf32, #tpu.memory_space<vmem>>, %arg4: memref<1x32x256xf32, #tpu.memory_space<vmem>>) attributes {dimension_semantics = [#tpu.dimension_semantics<parallel>], iteration_bounds = array<i64: 2>, scalar_prefetch = 0 : i64, scratch_operands = 0 : i64, tpu.core_type = #tpu.core_type<tc>, window_params = [{transform_indices = @transform_0, window_bounds = array<i64: 1, 32, 256>}, {pipeline_mode = #tpu.pipeline_mode<synchronous>, transform_indices = @transform_1, window_bounds = array<i64: 2, 32>}, {pipeline_mode = #tpu.pipeline_mode<synchronous>, transform_indices = @transform_2, window_bounds = array<i64: 32, 2>}, {transform_indices = @transform_3, window_bounds = array<i64: 1, 32, 256>}]} {
    %c0 = arith.constant 0 : index
    %c0_0 = arith.constant 0 : index
    %0 = vector.load %arg2[%c0, %c0_0] : memref<2x32xf32, #tpu.memory_space<vmem>>, vector<2x32xf32>
    %c0_1 = arith.constant 0 : index
    %c0_2 = arith.constant 0 : index
    %1 = vector.load %arg3[%c0_1, %c0_2] : memref<32x2xf32, #tpu.memory_space<vmem>>, vector<32x2xf32>
    %c0_i32 = arith.constant 0 : i32
    %c1_i32 = arith.constant 1 : i32
    %2 = arith.muli %c0_i32, %c1_i32 : i32
    %c0_i32_3 = arith.constant 0 : i32
    %3 = arith.addi %c0_i32_3, %2 : i32
    %4 = arith.index_cast %3 : i32 to index
    %c0_4 = arith.constant 0 : index
    %c0_5 = arith.constant 0 : index
    %5 = vector.load %arg1[%4, %c0_4, %c0_5] : memref<1x32x256xf32, #tpu.memory_space<vmem>>, vector<1x32x256xf32>
    %6 = vector.shape_cast %5 : vector<1x32x256xf32> to vector<32x256xf32>
    %cst = arith.constant dense<0.000000e+00> : vector<32xf32>
    %7 = vector.multi_reduction <add>, %6, %cst [1] : vector<32x256xf32> to vector<32xf32>
    %8 = vector.shape_cast %7 : vector<32xf32> to vector<32x1xf32>
    %cst_6 = arith.constant 3.906250e-03 : f32
    %9 = vector.broadcast %cst_6 : f32 to vector<32x1xf32>
    %10 = arith.mulf %8, %9 : vector<32x1xf32>
    %cst_7 = arith.constant dense<0xFF800000> : vector<32xf32>
    %11 = vector.multi_reduction <maximumf>, %6, %cst_7 [1] : vector<32x256xf32> to vector<32xf32>
    %12 = vector.shape_cast %11 : vector<32xf32> to vector<32x1xf32>
    %13 = tpu.concatenate %10, %12 in 1 : vector<32x1xf32>, vector<32x1xf32> -> vector<32x2xf32>
    %cst_8 = arith.constant dense<0.000000e+00> : vector<2x2xf32>
    %14 = tpu.matmul %0, %13, %cst_8 {dimension_numbers = #tpu.dot_dimension_numbers<[1], [0], [0], [1], [0, 0, 1, 1], [], []>} : vector<2x32xf32>, vector<32x2xf32>, vector<2x2xf32> -> vector<2x2xf32>
    %cst_9 = arith.constant 0.000000e+00 : f32
    %15 = vector.broadcast %cst_9 : f32 to vector<2x2xf32>
    %16 = arith.maximumf %14, %15 : vector<2x2xf32>
    %cst_10 = arith.constant dense<0.000000e+00> : vector<32x2xf32>
    %17 = tpu.matmul %1, %16, %cst_10 {dimension_numbers = #tpu.dot_dimension_numbers<[1], [0], [0], [1], [0, 0, 1, 1], [], []>} : vector<32x2xf32>, vector<2x2xf32>, vector<32x2xf32> -> vector<32x2xf32>
    %18 = vector.extract_strided_slice %17 {offsets = [0, 0], sizes = [32, 1], strides = [1, 1]} : vector<32x2xf32> to vector<32x1xf32>
    %19 = vector.extract_strided_slice %17 {offsets = [0, 1], sizes = [32, 1], strides = [1, 1]} : vector<32x2xf32> to vector<32x1xf32>
    %20 = arith.addf %18, %19 : vector<32x1xf32>
    %cst_11 = arith.constant 0.000000e+00 : f32
    %21 = vector.broadcast %cst_11 : f32 to vector<32x1xf32>
    %22 = arith.subf %21, %20 : vector<32x1xf32>
    %23 = math.exp %22 : vector<32x1xf32>
    %cst_12 = arith.constant 1.000000e+00 : f32
    %24 = vector.broadcast %cst_12 : f32 to vector<32x1xf32>
    %25 = arith.addf %24, %23 : vector<32x1xf32>
    %cst_13 = arith.constant 1.000000e+00 : f32
    %26 = vector.broadcast %cst_13 : f32 to vector<32x1xf32>
    %27 = arith.divf %26, %25 : vector<32x1xf32>
    %28 = vector.broadcast %27 : vector<32x1xf32> to vector<32x256xf32>
    %29 = arith.mulf %6, %28 : vector<32x256xf32>
    %30 = arith.index_cast %3 : i32 to index
    %c0_14 = arith.constant 0 : index
    %c0_15 = arith.constant 0 : index
    %31 = vector.load %arg4[%30, %c0_14, %c0_15] : memref<1x32x256xf32, #tpu.memory_space<vmem>>, vector<1x32x256xf32>
    %32 = vector.shape_cast %31 : vector<1x32x256xf32> to vector<32x256xf32>
    %33 = vector.shape_cast %29 : vector<32x256xf32> to vector<1x32x256xf32>
    tpu.vector_store %arg4[%30, %c0_14, %c0_15], %33 {strides = array<i32>} : memref<1x32x256xf32, #tpu.memory_space<vmem>>, vector<1x32x256xf32>,
    %c1_i32_16 = arith.constant 1 : i32
    return
  }
  func.func @transform_0(%arg0: i32) -> (i32, i32, i32) {
    %c0_i32 = arith.constant 0 : i32
    %c0_i32_0 = arith.constant 0 : i32
    %c0_i32_1 = arith.constant 0 : i32
    return %arg0, %c0_i32, %c0_i32_0 : i32, i32, i32
  }
  func.func @transform_1(%arg0: i32) -> (i32, i32) {
    %c0_i32 = arith.constant 0 : i32
    %c0_i32_0 = arith.constant 0 : i32
    %c0_i32_1 = arith.constant 0 : i32
    return %c0_i32, %c0_i32_0 : i32, i32
  }
  func.func @transform_2(%arg0: i32) -> (i32, i32) {
    %c0_i32 = arith.constant 0 : i32
    %c0_i32_0 = arith.constant 0 : i32
    %c0_i32_1 = arith.constant 0 : i32
    return %c0_i32, %c0_i32_0 : i32, i32
  }
  func.func @transform_3(%arg0: i32) -> (i32, i32, i32) {
    %c0_i32 = arith.constant 0 : i32
    %c0_i32_0 = arith.constant 0 : i32
    %c0_i32_1 = arith.constant 0 : i32
    return %arg0, %c0_i32, %c0_i32_0 : i32, i32, i32
  }
}

</mosaic_0001>

<bundles_post_ra>
// kernel: tpu_custom_call.1
= control target key start
LH: loop header
LB: loop body
LE: loop exit
PB: predicated region body
PF: predicated region fallthrough
CT: control target
= control target key end

     0   :  { %8 = vsyncpa [#allocation3], 0  ;;  %s1059_s0 = inlined_call_operand.hbm [shape: f32[2,32,256], index: 0, kind: input, shape index: {}]   ;;  %s1060_s1 = inlined_call_operand.vmem [shape: f32[2,32], index: 1, kind: input, shape index: {}]   ;;  %s1061_s2 = inlined_call_operand.vmem [shape: f32[32,2], index: 2, kind: input, shape index: {}]   ;;  %s1062_s3 = inlined_call_operand.hbm [shape: f32[2,32,256], index: 3, kind: output, shape index: {}]  }
   0x1   :  { %10 = vsyncpa [#allocation3 + $0x1], 0 }
   0x2   :  { %11 = vsyncpa [#allocation4], 0 }
   0x3   :  { %13 = vsyncpa [#allocation4 + $0x1], 0  ;;  %s838_s12 = smov 0   ;;  %s840_s13 = smov 0  }
   0x4   :  { %s842_s14 = smov 0   ;;  %s844_s15 = smov 0  }
   0x5 LB: > { %s859_s16 = sadd.s32 4294967295, %s805_s15   ;;  %s579_s17 = sadd.s32 4294967294, %s805_s15   ;;  %s805_s15 = sphi %s844_s15, %s1075_s15   ;;  %s801_s14 = sphi %s842_s14, %s1074_s14   ;;  %s797_s13 = sphi %s840_s13, %s1073_s13   ;;  %s793_s12 = sphi %s838_s12, %s1072_s12  }
   0x6   : > { %s863_s18 = sadd.s32 1, %s805_s15   ;;  %s26_s19 = sadd.s32 1, %s801_s14 }
   0x7   : > { %s23_s20 = ssub.s32 %s805_s15, %s863_s18  ;;  %p33_p0 = scmp.ne.s32.totalorder %s801_s14, %s797_s13 }
   0x8   : > { %p24_p1 = scmp.eq.s32.totalorder %s23_s20, 0  ;;  %p34_p2 = scmp.eq.s32.totalorder %s805_s15, 0 }
   0x9   : > { %p39_p3 = scmp.ne.s32.totalorder %s797_s13, %s793_s12  ;;  %p40_p4 = scmp.eq.s32.totalorder %s859_s16, 0 }
   0xa   : > { %s875_s21 = scalar_select %p24_p1, %s801_s14, %s26_s19  }
   0xb   : > { %p877_p5 = por %p34_p2, %p33_p0  ;;  %p881_p6 = por %p40_p4, %p39_p3 }
   0xc   : > { %p105_p7 = scmp.eq.s32.totalorder %s859_s16, 1  ;;  %p111_p8 = scmp.eq.s32.totalorder %s579_s17, 1 }
   0xd   : > { %p648_p10 = scmp.lt.s32.totalorder %s805_s15, 2  ;;  %s137_s26 = sand.u32 1, %s801_s14  }
   0xe   : > { %p888_p11 = por %p105_p7, %p33_p0  ;;  %p892_p12 = por %p111_p8, %p39_p3 }
   0xf   : > { %s599_s27 = sshll.u32 %s805_s15, 10  ;;  %s582_s28 = sshll.u32 %s137_s26, 6 }
  0x10   : > { %s1066_s24 = scalar_select %p888_p11, 1, 0 }
  0x11   : > { %s1067_s25 = scalar_select %p892_p12, 1, 0 }
  0x12   : > { %s901_s4 = scalar_lea.hbm %s1059_s0, %s599_s27  ;;  %s141_s5 = scalar_lea.vmem [#allocation2], %s582_s28 }
  0x13   : > { %s148_s6 = sshll.u32 %s141_s5, 4  ;;  %p905_p13 = pnand %p648_p10, %p877_p5  ;;  %s909_s6 = int_to_ptr.vmem [resolvable:$true] %s148_s6 }
  0x14   : > { %s911_s8 = scalar_lea.sflag [#allocation3], %s137_s26  ;;  %s709_s9 = scalar_lea.hbm %s901_s4, 1024 }
  0x15   : > { %p710_p0 = scmp.ne.s32.totalorder %s901_s4, %s709_s9  ;;  %p711_p1 = pneg %p905_p13 }
  0x16   : > { %s714_s17 = scalar_lea.hbm %s1059_s0, 2048  ;;  %p715_p4 = scmp.lt.u32.totalorder %s901_s4, %s1059_s0 }
  0x17   : > { %p712_p2 = pnand %p711_p1, %p710_p0  ;;  %p716_p5 = scmp.lt.u32.totalorder %s714_s17, %s709_s9 }
  0x18   : > { %p718_p8 = scmp.lt.u32.totalorder %s709_s9, %s901_s4 }
  0x19   : > { %p713_p3 = pneg %p712_p2  ;;  %p717_p7 = por %p716_p5, %p715_p4 }
  0x1b   : > { %p719_p10 = por %p718_p8, %p717_p7 }
  0x1d   : > { %p720_p9 = pnand %p719_p10, %p713_p3 }
  0x1f   : > { %723 = shalt.err (!%p720_p9)
}
  0x20   : > { %s724_s22 = scalar_lea.vmem %s909_s6, 1024  ;;  %s807_s26 = smov [#allocation2]  }
  0x21   : > { %p725_p0 = scmp.ne.s32.totalorder %s909_s6, %s724_s22  ;;  %s729_s27 = sshll.u32 %s807_s26, 4  ;;  %s730_s27 = int_to_ptr.vmem [resolvable:$false] %s729_s27 }
  0x22   : > { %s731_s28 = scalar_lea.vmem %s730_s27, 2048  ;;  %p732_p11 = scmp.lt.s32.totalorder %s909_s6, %s730_s27 }
  0x23   : > { %p727_p2 = pnand %p725_p0, %p711_p1  ;;  %p733_p4 = scmp.lt.s32.totalorder %s731_s28, %s724_s22 }
  0x25   : > { %p728_p12 = pneg %p727_p2  ;;  %p734_p5 = por %p733_p4, %p732_p11 }
  0x27   : > { %p735_p7 = pnand %p734_p5, %p728_p12 }
  0x29   : > { %738 = shalt.err (!%p735_p7)
}
  0x2a   : > { %s808_s29 = smov 256   ;;  %s809_s30 = smov 16  }
  0x2b   : > { %643 = dma.hbm_to_vmem [thread:$0]  (!%p905_p13), %s901_s4, 1024, %s909_s6, %s911_s8, %s808_s29, %s808_s29, %s809_s30  }
  0x2c   : > { %p585_p9 = scmp.ge.s32.totalorder %s805_s15, 1  ;;  %p156_p1 = scmp.lt.s32.totalorder %s805_s15, 3 }
  0x2e   : > { %p157_p3 = pnand %p585_p9, %p156_p1 }
  0x2f   : > { %s942_s5 = sand.u32 (!%p157_p3), 1, %s797_s13  }
  0x30   : > { %160 = sbr.rel (%p157_p3) target bundleno = 946 (0x3b2), region = 32  ;;  %s586_s9 = sshll.u32 (!%p157_p3), %s942_s5, 6 }
  0x31   : > { %s163_s10 = scalar_lea.sflag (!%p157_p3), [#allocation3], %s942_s5  ;;  %s166_s11 = scalar_lea.vmem (!%p157_p3), [#allocation2], %s586_s9 }
  0x37   : > { %784 = dma.done.wait (%p881_p6), %s163_s10, 1024  }
  0x38   : > { %786 = vsyncadd (%p881_p6), %s163_s10, 4294966272  ;;  %v952_v0 = vld [vmem:[%s166_s11] sm:$0xff]  ;;  %v954_v1 = vld [vmem:[%s166_s11 + $0x8] sm:$0xff]  ;;  %v810_v16 = vmov 0.0|0.0   ;;  %vm811_vm0 = vmmov 0   ;;  %v812_v17 = vmov 0.0  }
  0x39   : > { %v956_v2 = vld [vmem:[%s166_s11 + $0x10] sm:$0xff]  ;;  %v218_v3 = vmax.f32 %v952_v0, %v954_v1  ;;  %v202_v4 = vadd.f32 %v954_v1, %v952_v0  ;;  %v962_v5 = vld [vmem:[%s166_s11 + $0x18] sm:$0xff]  ;;  %v972_v10 = vld [vmem:[%s166_s11 + $0x20] sm:$0xff]  ;;  %630 = vmatprep.subr.bf16.mxu0 %v810_v16  ;;  %619 = vmatprep.mubr.msk.f32.mxu0 %vm811_vm0, %v812_v17  ;;  %vm230_vm1 = vcmask 7168   ;;  %vm235_vm2 = vcmask 261120   ;;  %s813_s27 = smov 127  }
  0x3a   : > { %v221_v6 = vmax.f32 %v956_v2, %v962_v5  ;;  %v205_v7 = vadd.f32 %v962_v5, %v956_v2  ;;  %v968_v8 = vld [vmem:[%s166_s11 + $0x30] sm:$0xff]  ;;  %v970_v9 = vld [vmem:[%s166_s11 + $0x38] sm:$0xff]  ;;  %v974_v11 = vld [vmem:[%s166_s11 + $0x28] sm:$0xff]  ;;  %vm310_vm3 = vcmask 15360   ;;  %vm323_vm4 = vcmask 1041408   ;;  %s188_s28 = scalar_lea.vmem [#allocation5], %s586_s9 }
  0x3b   : > { %219 = vmax.xlane.f32.xlu1 %v218_v3  ;;  %203 = vadd.xlane.f32.xlu0 %v202_v4  ;;  %v211_v12 = vadd.f32 %v970_v9, %v968_v8  ;;  %v208_v13 = vadd.f32 %v974_v11, %v972_v10  ;;  %v227_v14 = vmax.f32 %v968_v8, %v970_v9  ;;  %v189_v36 = vld [vmem:[%s1060_s1] sm:$0x3]  ;;  %v191_v41 = vld [vmem:[%s1061_s2 + $0x8] sm:$0xff]  ;;  %v192_v42 = vld [vmem:[%s1061_s2 + $0x10] sm:$0xff]  ;;  %v814_v48 = vmov 0   ;;  %s506_s29 = sshll.u32 %s188_s28, 4  ;;  %s1008_s29 = int_to_ptr.vmem [resolvable:$true] %s506_s29 }
  0x3c   : > { %v224_v15 = vmax.f32 %v972_v10, %v974_v11  ;;  %v190_v37 = vld [vmem:[%s1061_s2] sm:$0xff]  ;;  %v193_v43 = vld [vmem:[%s1061_s2 + $0x18] sm:$0xff]  ;;  %691 = vset.pattern.permute.xlu1 %v814_v48  ;;  %692 = vset.pattern.permute.xlu0 %v814_v48  ;;  %s600_s30 = sshll.u32 %s859_s16, 10  ;;  %s493_s16 = scalar_lea.sflag [#allocation4], %s942_s5 }
  0x3d   : > { %624 = vmatprep.mubr.msk.f32.mxu1 %vm310_vm3, %v190_v37  ;;  %s1013_s11 = scalar_lea.hbm %s1062_s3, %s600_s30  ;;  %s739_s23 = scalar_lea.vmem %s1008_s29, 1024 }
  0x3e   : > { %p740_p6 = scmp.ne.s32.totalorder %s1008_s29, %s739_s23  ;;  %p1069_p11 = scmp.ne.s32.totalorder %s1066_s24, 0 }
  0x3f   : > { %222 = vmax.xlane.f32.xlu1 %v221_v6  ;;  %206 = vadd.xlane.f32.xlu0 %v205_v7  ;;  %s815_s4 = smov [#allocation5]  }
  0x40   : > { %p741_p12 = pnand %p740_p6, %p1069_p11  ;;  %s743_s6 = sshll.u32 %s815_s4, 4  ;;  %s744_s6 = int_to_ptr.vmem [resolvable:$false] %s743_s6 }
  0x41   : > { %s745_s7 = scalar_lea.vmem %s744_s6, 2048  ;;  %p746_p8 = scmp.lt.s32.totalorder %s1008_s29, %s744_s6 }
  0x42   : > { %p742_p13 = pneg %p741_p12  ;;  %p747_p10 = scmp.lt.s32.totalorder %s745_s7, %s739_s23 }
  0x43   : > { %212 = vadd.xlane.f32.xlu1 %v211_v12  ;;  %209 = vadd.xlane.f32.xlu0 %v208_v13 }
  0x44   : > { %p748_p0 = por %p747_p10, %p746_p8 }
  0x46   : > { %p749_p2 = pnand %p748_p0, %p742_p13 }
  0x47   : > { %228 = vmax.xlane.f32.xlu1 %v227_v14  ;;  %225 = vmax.xlane.f32.xlu0 %v224_v15 }
  0xc8   : > { %v220_v18 = vpop.xlane.xlu1 %219  ;;  %v204_v19 = vpop.xlane.xlu0 %203 }
  0xc9   : > { %v214_v20 = vmul.f32 0.00390625, %v204_v19 }
  0xcb   : > { %v231_v24 = vsel %vm230_vm1, %v214_v20, %v220_v18 }
  0xcc   : > { %v223_v21 = vpop.xlane.xlu1 %222  ;;  %v207_v22 = vpop.xlane.xlu0 %206 }
  0xcd   : > { %v215_v23 = vmul.f32 0.00390625, %v207_v22 }
  0xcf   : > { %v232_v25 = vsel %vm230_vm1, %v215_v23, %v223_v21 }
  0xd0   : > { %v213_v26 = vpop.xlane.xlu1 %212  ;;  %v210_v27 = vpop.xlane.xlu0 %209  ;;  %v631_v28 = vpack.c.bf16 %v232_v25, %v231_v24 }
  0xd1   : > { %v217_v29 = vmul.f32 0.00390625, %v213_v26  ;;  %v216_v30 = vmul.f32 0.00390625, %v210_v27 }
  0xd2   : > { %632 = vmatpush3.bf16.msra.mxu0 %v631_v28 }
  0xd3   : > { %633 = vmatprep.subr.bf16.mxu0 %v810_v16 }
  0xd4   : > { %v229_v31 = vpop.xlane.xlu1 %228  ;;  %v226_v32 = vpop.xlane.xlu0 %225 }
  0xd5   : > { %v234_v33 = vsel %vm230_vm1, %v217_v29, %v229_v31  ;;  %v233_v34 = vsel %vm230_vm1, %v216_v30, %v226_v32 }
  0xd6   : > { %v634_v35 = vpack.c.bf16 %v234_v33, %v233_v34 }
  0xd8   : > { %635 = vmatpush3.bf16.msra.mxu0 %v634_v35 }
  0xdb   : > { %620 = vmatmul.mubr.msk.f32.vlgmr.msra.gmra.mrb[0].mxu0 %vm235_vm2, %v189_v36 }
 0x1ae   : > { %v305_v38 = vpop.f32.mrb[0].mxu0 }
 0x1af   : > { %v309_v39 = vmax.f32 %v305_v38, 0.0  ;;  %v621_v40 = vpop.f32.mrb[1].mxu0 }
 0x1b1   : > { %622 = vmatprep.subr.msk.mxu1 %vm323_vm4, %v309_v39 }
 0x1b2   : > { %623 = vmatpush3.msk.msra.mxu1 %vm323_vm4, %v309_v39 }
 0x1b3   : > { %625 = vmatmul.mubr.msk.f32.vlgmr.msra.gmra.mrb[0].mxu1 %vm310_vm3, %v191_v41 }
 0x1b4   : > { %627 = vmatprep.mubr.msk.f32.mxu1 %vm310_vm3, %v192_v42 }
 0x1b7   : > { %628 = vmatmul.mubr.msk.f32.gmra.mrb[2].mxu1 %vm310_vm3, %v193_v43 }
 0x286   : > { %v626_v44 = vpop.f32.mrb[0].mxu1 }
 0x287   : > { %418 = vrot.lane.b32.xlu1 %v626_v44, %s813_s27  ;;  %v393_v45 = vpop.f32.mrb[1].mxu1 }
 0x288   : > { %416 = vrot.lane.b32.xlu0 %v393_v45, %s813_s27 }
 0x28a   : > { %v629_v46 = vpop.f32.mrb[2].mxu1 }
 0x28b   : > { %v403_v47 = vpop.f32.mrb[3].mxu1 }
 0x28c   : > { %420 = vrot.lane.b32.xlu1 %v403_v47, %s813_s27 }
 0x290   : > { %422 = vrot.lane.b32.xlu1 %v629_v46, %s813_s27 }
 0x2f9   : > { %v419_v49 = vpop.permute.xlu1 %418 }
 0x2fa   : > { %v429_v50 = vadd.f32 %v626_v44, %v419_v49  ;;  %v417_v51 = vpop.permute.xlu0 %416 }
 0x2fb   : > { %v428_v52 = vadd.f32 %v417_v51, %v393_v45 }
 0x2fc   : > { %v433_v53 = vsub.f32 0.0, %v429_v50 }
 0x2fd   : > { %v432_v54 = vsub.f32 0.0, %v428_v52 }
 0x2fe   : > { %v438_v55 = vmul.f32 1.442695, %v433_v53  ;;  %v421_v56 = vpop.permute.xlu1 %420 }
 0x2ff   : > { %v436_v57 = vmul.f32 1.442695, %v432_v54  ;;  %v430_v58 = vadd.f32 %v421_v56, %v403_v47 }
 0x300   : > { %693 = vpow2.f32 %v438_v55 }
 0x301   : > { %695 = vpow2.f32 %v436_v57  ;;  %v434_v59 = vsub.f32 0.0, %v430_v58 }
 0x302   : > { %v423_v60 = vpop.permute.xlu1 %422 }
 0x303   : > { %v440_v61 = vmul.f32 1.442695, %v434_v59  ;;  %v431_v62 = vadd.f32 %v629_v46, %v423_v60 }
 0x305   : > { %697 = vpow2.f32 %v440_v61  ;;  %v435_v63 = vsub.f32 0.0, %v431_v62 }
 0x307   : > { %v442_v3 = vmul.f32 1.442695, %v435_v63 }
 0x309   : > { %699 = vpow2.f32 %v442_v3 }
 0x30a   : > { %v694_v4 = vpop.eup %693 }
 0x30b   : > { %v696_v6 = vpop.eup %695  ;;  %v445_v7 = vadd.f32 1.0, %v694_v4 }
 0x30c   : > { %v444_v12 = vadd.f32 1.0, %v696_v6 }
 0x30d   : > { %701 = vrcp.f32 %v445_v7 }
 0x30e   : > { %703 = vrcp.f32 %v444_v12 }
 0x30f   : > { %v698_v13 = vpop.eup %697 }
 0x310   : > { %v446_v14 = vadd.f32 1.0, %v698_v13 }
 0x312   : > { %705 = vrcp.f32 %v446_v14 }
 0x313   : > { %v700_v15 = vpop.eup %699 }
 0x314   : > { %v447_v16 = vadd.f32 1.0, %v700_v15 }
 0x316   : > { %707 = vrcp.f32 %v447_v16 }
 0x317   : > { %v702_v17 = vpop.eup %701 }
 0x318   : > { %v704_v18 = vpop.eup %703  ;;  %463 = vperm.xlu1 %691, %v702_v17  }
 0x319   : > { %458 = vperm.xlu0 %692, %v704_v18  }
 0x31c   : > { %v706_v19 = vpop.eup %705 }
 0x31d   : > { %468 = vperm.xlu1 %691, %v706_v19  }
 0x320   : > { %v708_v20 = vpop.eup %707 }
 0x321   : > { %473 = vperm.xlu0 %692, %v708_v20  }
 0x397   : > { %v464_v21 = vpop.permute.xlu1 %463 }
 0x398   : > { %v478_v22 = vmul.f32 %v464_v21, %v956_v2  ;;  %v479_v23 = vmul.f32 %v464_v21, %v962_v5  ;;  %v459_v24 = vpop.permute.xlu0 %458 }
 0x399   : > { %v476_v25 = vmul.f32 %v459_v24, %v952_v0  ;;  %v477_v26 = vmul.f32 %v459_v24, %v954_v1 }
 0x39a   : > { %486 = vst [vmem:[%s188_s28 + $0x10] sm:$0xff] %v478_v22  ;;  %487 = vst [vmem:[%s188_s28 + $0x18] sm:$0xff] %v479_v23 }
 0x39b   : > { %484 = vst [vmem:[%s188_s28] sm:$0xff] %v476_v25  ;;  %485 = vst [vmem:[%s188_s28 + $0x8] sm:$0xff] %v477_v26 }
 0x39c   : > { %v469_v27 = vpop.permute.xlu1 %468 }
 0x39d   : > { %v480_v28 = vmul.f32 %v469_v27, %v972_v10  ;;  %v481_v2 = vmul.f32 %v469_v27, %v974_v11 }
 0x39f   : > { %488 = vst [vmem:[%s188_s28 + $0x20] sm:$0xff] %v480_v28  ;;  %489 = vst [vmem:[%s188_s28 + $0x28] sm:$0xff] %v481_v2 }
 0x3a0   : > { %v474_v0 = vpop.permute.xlu0 %473 }
 0x3a1   : > { %v482_v1 = vmul.f32 %v474_v0, %v968_v8  ;;  %v483_v5 = vmul.f32 %v474_v0, %v970_v9 }
 0x3a3   : > { %490 = vst [vmem:[%s188_s28 + $0x30] sm:$0xff] %v482_v1  ;;  %491 = vst [vmem:[%s188_s28 + $0x38] sm:$0xff] %v483_v5 }
 0x3a4   : > { %752 = shalt.err (!%p749_p2)
}
 0x3a5   : > { %s753_s8 = scalar_lea.hbm %s1013_s11, 1024  ;;  %s757_s20 = scalar_lea.hbm %s1062_s3, 2048 }
 0x3a6   : > { %p754_p4 = scmp.ne.s32.totalorder %s1013_s11, %s753_s8  ;;  %p758_p9 = scmp.lt.u32.totalorder %s1013_s11, %s1062_s3 }
 0x3a7   : > { %p759_p1 = scmp.lt.u32.totalorder %s757_s20, %s753_s8  ;;  %p761_p6 = scmp.lt.u32.totalorder %s753_s8, %s1013_s11 }
 0x3a8   : > { %p755_p5 = pnand %p754_p4, %p1069_p11 }
 0x3a9   : > { %p760_p3 = por %p759_p1, %p758_p9 }
 0x3aa   : > { %p756_p7 = pneg %p755_p5 }
 0x3ab   : > { %p762_p12 = por %p761_p6, %p760_p3 }
 0x3ad   : > { %p763_p13 = pnand %p762_p12, %p756_p7 }
 0x3af   : > { %766 = shalt.err (!%p763_p13)
}
 0x3b0   : > { %s816_s27 = smov 256   ;;  %s817_s28 = smov 16  }
 0x3b1   : > { %638 = dma.vmem_to_hbm [thread:$0]  (%p1069_p11), %s1008_s29, 1024, %s1013_s11, %s493_s16, %s816_s27, %s816_s27, %s817_s28  }
 0x3b2 PF: > { %s521_s30 = sand.u32 1, %s793_s12   ;;  %p1070_p8 = scmp.ne.s32.totalorder %s1067_s25, 0 }
 0x3b3   : > { %p1071_p10 = scmp.ge.s32.totalorder %s805_s15, 2  ;;  %s522_s9 = scalar_lea.sflag [#allocation4], %s521_s30 }
 0x3b5   : > { %p645_p0 = pnand %p1071_p10, %p1070_p8 }
 0x3b7   : > { %788 = dma.done.wait (!%p645_p0), %s522_s9, 1024  }
 0x3b8   : > { %790 = vsyncadd (!%p645_p0), %s522_s9, 4294966272  ;;  %p16_p2 = scmp.ge.s32.totalorder %s863_s18, 4   ;;  %s1072_s12 = smov %s797_s13 }
 0x3b9   : > { %s1073_s13 = smov %s801_s14  ;;  %s1074_s14 = smov %s875_s21 }
 0x3ba   : > { %s1075_s15 = smov %s863_s18  ;;  %18 = sbr.rel (!%p16_p2) target bundleno = 5 (0x5), region = 77 }
 0x3c1   :  { %527 = vsyncpa [#allocation3], 1 }
 0x3c2   :  { %529 = vsyncpa [#allocation3 + $0x1], 1 }
 0x3c3   :  { %530 = vsyncpa [#allocation4], 1 }
 0x3c4   :  { %532 = vsyncpa [#allocation4 + $0x1], 1 }

</bundles_post_ra>
